<compile_context>
chip_gen: v7x
topology: tpu7x:2x2x1
jax: 0.10.0
libtpu: 0.0.40
codegen_flags: <defaults>
</compile_context>

<pallas_src>
import math
import functools

import jax
import jax.numpy as jnp
from jax.experimental import pallas as pl
from jax.experimental.pallas import tpu as pltpu

_LANE = 128


def _pos_emb_packed_kernel(x_ref, out_ref, *, dim, half_dim, base_freq, groups):
    """Lane-dense path (dim < 128 and dim divides 128).

    x_ref:   (TR, G)    f32, G = 128 // dim timesteps per output row.
    out_ref: (TR, 128)  out_dtype; lane l of row r holds embedding column
             (l % dim) of batch element r*G + l // dim.
    """
    scale = math.log(base_freq) / (half_dim - 1)

    lane = jax.lax.broadcasted_iota(jnp.int32, (1, _LANE), 1)
    col = jnp.bitwise_and(lane, jnp.int32(dim - 1))          # l % dim (dim = 2^k)
    is_sin = col < half_dim
    fidx = jnp.where(is_sin, col, col - half_dim).astype(jnp.float32)
    freqs = jnp.exp(fidx * jnp.float32(-scale))              # (1, 128) constant row

    xg = x_ref[...]                                          # (TR, G) f32
    # Broadcast each timestep across its dim lanes with a short static select
    # chain (== xg[:, l // dim]); pure VPU work, no gather / XLU shuffle.
    xb = xg[:, 0:1]
    for g in range(1, groups):
        xb = jnp.where(lane >= g * dim, xg[:, g:g + 1], xb)  # (TR, 128)

    arg = xb * freqs                                         # (TR, 128)
    # cos computed directly (not sin(t+pi/2)): exact for large timesteps; the
    # redundant half of each transcendental hides behind the store stream.
    out = jnp.where(is_sin, jnp.sin(arg), jnp.cos(arg))
    out_ref[...] = out.astype(out_ref.dtype)                 # one unmasked store


def _pos_emb_rows_kernel(x_ref, out_ref, *, dim, half_dim, base_freq):
    """General path (dim >= 128, or dim not a divisor of 128).

    x_ref:   (TB, 1)    f32
    out_ref: (TB, dim)  out_dtype = [sin(x*f) | cos(x*f)]
    """
    scale = math.log(base_freq) / (half_dim - 1)
    col = jax.lax.broadcasted_iota(jnp.int32, (1, dim), 1)
    is_sin = col < half_dim
    fidx = jnp.where(is_sin, col, col - half_dim).astype(jnp.float32)
    freqs = jnp.exp(fidx * jnp.float32(-scale))              # (1, dim)

    x = x_ref[...]                                           # (TB, 1)
    arg = x * freqs                                          # (TB, dim)
    out = jnp.where(is_sin, jnp.sin(arg), jnp.cos(arg))
    out_ref[...] = out.astype(out_ref.dtype)
    # TODO(synk): on v7x the broadcast-multiply could move to the idle MXU
    # (rank-1 dot) and the (TB, 1) input could be fed lane-dense; both are
    # minor next to the dim-wide output stream on this path.


def _rows_per_step(total_rows, row_bytes, sublane, vmem_tile_bytes):
    """Output rows per grid step: VMEM-budgeted, sublane-aligned, and >= 2
    grid steps when the problem is big enough (so v7x's two TCs both work)."""
    if total_rows <= sublane:
        return total_rows                                    # single full block
    cap = max(sublane, (vmem_tile_bytes // (2 * row_bytes)) // sublane * sublane)
    if total_rows <= cap:
        half = (total_rows + 1) // 2
        tr = ((half + sublane - 1) // sublane) * sublane
        return min(tr, cap)
    return cap


def sinusoidal_pos_emb(x, dim, base_freq=10000.0, out_dtype=jnp.float32,
                       vmem_tile_bytes=4 * 1024 * 1024):
    """Pallas equivalent of SinusoidalPosEmb.forward.

    x: (B,) positions / timesteps. Returns (B, dim) = [sin | cos].
    out_dtype=bfloat16 halves HBM writeback (the v5e bottleneck); math is f32.
    """
    assert dim % 2 == 0 and dim >= 4, "dim must be even and >= 4"
    half_dim = dim // 2
    B = x.shape[0]
    out_bytes = jnp.dtype(out_dtype).itemsize
    sublane = max(8, 32 // out_bytes)            # 8 f32 / 16 bf16 / 32 int8
    x32 = x.astype(jnp.float32)

    packed = (dim < _LANE) and (_LANE % dim == 0) and (B % (_LANE // dim) == 0)

    if packed:
        groups = _LANE // dim                    # timesteps per 128-lane row
        rows = B // groups
        tr = _rows_per_step(rows, _LANE * out_bytes, sublane, vmem_tile_bytes)
        kernel = functools.partial(
            _pos_emb_packed_kernel, dim=dim, half_dim=half_dim,
            base_freq=float(base_freq), groups=groups)
        out = pl.pallas_call(
            kernel,
            out_shape=jax.ShapeDtypeStruct((rows, _LANE), out_dtype),
            grid=(pl.cdiv(rows, tr),),
            in_specs=[pl.BlockSpec((tr, groups), lambda i: (i, 0))],
            out_specs=pl.BlockSpec((tr, _LANE), lambda i: (i, 0)),
            compiler_params=pltpu.CompilerParams(
                dimension_semantics=("parallel",)),
        )(x32.reshape(rows, groups))
        return out.reshape(B, dim)               # free: same row-major bytes

    tb = _rows_per_step(B, dim * out_bytes, sublane, vmem_tile_bytes)
    kernel = functools.partial(
        _pos_emb_rows_kernel, dim=dim, half_dim=half_dim,
        base_freq=float(base_freq))
    return pl.pallas_call(
        kernel,
        out_shape=jax.ShapeDtypeStruct((B, dim), out_dtype),
        grid=(pl.cdiv(B, tb),),
        in_specs=[pl.BlockSpec((tb, 1), lambda i: (i, 0))],
        out_specs=pl.BlockSpec((tb, dim), lambda i: (i, 0)),
        compiler_params=pltpu.CompilerParams(
            dimension_semantics=("parallel",)),
    )(x32.reshape(B, 1))

# TODO(synk): at the production size (B~8, dim~32 -> ~1 KiB of output) this op
# is pure launch/DMA overhead; fuse it as a prologue of the consumer time-MLP
# kernel (the lane-packed freq trick ports directly) rather than shipping it
# as a standalone pallas_call.


def _reference(x, dim, base_freq=10000.0):
    half_dim = dim // 2
    scale = math.log(base_freq) / (half_dim - 1)
    freqs = jnp.exp(jnp.arange(half_dim, dtype=jnp.float32) * -scale)
    emb = x.astype(jnp.float32)[:, None] * freqs[None, :]
    return jnp.concatenate([jnp.sin(emb), jnp.cos(emb)], axis=-1)


if __name__ == "__main__":
    key = jax.random.PRNGKey(0)

    # Configs: packed lane-dense path (dim<128, single block), packed path with
    # multiple / ragged grid steps, and the general dim>=128 row path.
    for B, DIM in [(8, 32), (40, 32), (8, 256)]:
        kx, key = jax.random.split(key)
        # timesteps as typically fed to this module in a diffusion model
        x = jax.random.uniform(kx, (B,), dtype=jnp.float32,
                               minval=0.0, maxval=1000.0)
        out = jax.block_until_ready(sinusoidal_pos_emb(x, DIM))
        ref = _reference(x, DIM)
        assert out.shape == (B, DIM), (out.shape, B, DIM)
        assert jnp.allclose(out, ref, atol=1e-4, rtol=1e-4), (
            f"mismatch vs reference at B={B}, dim={DIM}")

    print("KERNEL_OK")
</pallas_src>

<mosaic_0001>
module attributes {stable_mosaic.version = 11 : i64} {
  func.func @_pos_emb_packed_kernel(%arg0: i32, %arg1: memref<2x4xf32, #tpu.memory_space<vmem>>, %arg2: memref<2x128xf32, #tpu.memory_space<vmem>>) attributes {dimension_semantics = [#tpu.dimension_semantics<parallel>], iteration_bounds = array<i64: 1>, scalar_prefetch = 0 : i64, scratch_operands = 0 : i64, tpu.core_type = #tpu.core_type<tc>, window_params = [{transform_indices = @transform_0, window_bounds = array<i64: 2, 4>}, {transform_indices = @transform_1, window_bounds = array<i64: 2, 128>}]} {
    %0 = tpu.iota {dimensions = array<i32: 1>} : vector<1x128xi32>
    %c31_i32 = arith.constant 31 : i32
    %1 = vector.broadcast %c31_i32 : i32 to vector<1x128xi32>
    %2 = arith.andi %0, %1 : vector<1x128xi32>
    %c16_i32 = arith.constant 16 : i32
    %3 = vector.broadcast %c16_i32 : i32 to vector<1x128xi32>
    %4 = arith.cmpi slt, %2, %3 : vector<1x128xi32>
    %c16_i32_0 = arith.constant 16 : i32
    %5 = vector.broadcast %c16_i32_0 : i32 to vector<1x128xi32>
    %6 = arith.subi %2, %5 : vector<1x128xi32>
    %7 = arith.select %4, %2, %6 : vector<1x128xi1>, vector<1x128xi32>
    %8 = arith.sitofp %7 : vector<1x128xi32> to vector<1x128xf32>
    %cst = arith.constant -0.614022672 : f32
    %9 = vector.broadcast %cst : f32 to vector<1x128xf32>
    %10 = arith.mulf %8, %9 : vector<1x128xf32>
    %11 = math.exp %10 : vector<1x128xf32>
    %c0 = arith.constant 0 : index
    %c0_1 = arith.constant 0 : index
    %12 = vector.load %arg1[%c0, %c0_1] : memref<2x4xf32, #tpu.memory_space<vmem>>, vector<2x4xf32>
    %13 = vector.extract_strided_slice %12 {offsets = [0, 0], sizes = [2, 1], strides = [1, 1]} : vector<2x4xf32> to vector<2x1xf32>
    %c32_i32 = arith.constant 32 : i32
    %14 = vector.broadcast %c32_i32 : i32 to vector<1x128xi32>
    %15 = arith.cmpi sge, %0, %14 : vector<1x128xi32>
    %16 = vector.extract_strided_slice %12 {offsets = [0, 1], sizes = [2, 1], strides = [1, 1]} : vector<2x4xf32> to vector<2x1xf32>
    %17 = vector.shape_cast %15 : vector<1x128xi1> to vector<1x128xi1>
    %18 = vector.broadcast %17 : vector<1x128xi1> to vector<2x128xi1>
    %19 = vector.shape_cast %16 : vector<2x1xf32> to vector<2x1xf32>
    %20 = vector.broadcast %19 : vector<2x1xf32> to vector<2x128xf32>
    %21 = vector.shape_cast %13 : vector<2x1xf32> to vector<2x1xf32>
    %22 = vector.broadcast %21 : vector<2x1xf32> to vector<2x128xf32>
    %23 = arith.select %18, %20, %22 : vector<2x128xi1>, vector<2x128xf32>
    %c64_i32 = arith.constant 64 : i32
    %24 = vector.broadcast %c64_i32 : i32 to vector<1x128xi32>
    %25 = arith.cmpi sge, %0, %24 : vector<1x128xi32>
    %26 = vector.extract_strided_slice %12 {offsets = [0, 2], sizes = [2, 1], strides = [1, 1]} : vector<2x4xf32> to vector<2x1xf32>
    %27 = vector.shape_cast %25 : vector<1x128xi1> to vector<1x128xi1>
    %28 = vector.broadcast %27 : vector<1x128xi1> to vector<2x128xi1>
    %29 = vector.shape_cast %26 : vector<2x1xf32> to vector<2x1xf32>
    %30 = vector.broadcast %29 : vector<2x1xf32> to vector<2x128xf32>
    %31 = arith.select %28, %30, %23 : vector<2x128xi1>, vector<2x128xf32>
    %c96_i32 = arith.constant 96 : i32
    %32 = vector.broadcast %c96_i32 : i32 to vector<1x128xi32>
    %33 = arith.cmpi sge, %0, %32 : vector<1x128xi32>
    %34 = vector.extract_strided_slice %12 {offsets = [0, 3], sizes = [2, 1], strides = [1, 1]} : vector<2x4xf32> to vector<2x1xf32>
    %35 = vector.shape_cast %33 : vector<1x128xi1> to vector<1x128xi1>
    %36 = vector.broadcast %35 : vector<1x128xi1> to vector<2x128xi1>
    %37 = vector.shape_cast %34 : vector<2x1xf32> to vector<2x1xf32>
    %38 = vector.broadcast %37 : vector<2x1xf32> to vector<2x128xf32>
    %39 = arith.select %36, %38, %31 : vector<2x128xi1>, vector<2x128xf32>
    %40 = vector.broadcast %11 : vector<1x128xf32> to vector<2x128xf32>
    %41 = arith.mulf %39, %40 : vector<2x128xf32>
    %42 = math.sin %41 : vector<2x128xf32>
    %43 = math.cos %41 : vector<2x128xf32>
    %44 = vector.shape_cast %4 : vector<1x128xi1> to vector<1x128xi1>
    %45 = vector.broadcast %44 : vector<1x128xi1> to vector<2x128xi1>
    %46 = arith.select %45, %42, %43 : vector<2x128xi1>, vector<2x128xf32>
    %c0_2 = arith.constant 0 : index
    %c0_3 = arith.constant 0 : index
    %47 = vector.load %arg2[%c0_2, %c0_3] : memref<2x128xf32, #tpu.memory_space<vmem>>, vector<2x128xf32>
    tpu.vector_store %arg2[%c0_2, %c0_3], %46 {strides = array<i32>} : memref<2x128xf32, #tpu.memory_space<vmem>>, vector<2x128xf32>,
    return
  }
  func.func @transform_0(%arg0: i32) -> (i32, i32) {
    %c0_i32 = arith.constant 0 : i32
    %c0_i32_0 = arith.constant 0 : i32
    return %arg0, %c0_i32 : i32, i32
  }
  func.func @transform_1(%arg0: i32) -> (i32, i32) {
    %c0_i32 = arith.constant 0 : i32
    %c0_i32_0 = arith.constant 0 : i32
    return %arg0, %c0_i32 : i32, i32
  }
}

</mosaic_0001>

<bundles_post_ra>
// kernel: tpu_custom_call.1
= control target key start
LH: loop header
LB: loop body
LE: loop exit
PB: predicated region body
PF: predicated region fallthrough
CT: control target
= control target key end

     0   :  { %6 = vsyncpa [#allocation3], 0  ;;  %s448_s0 = inlined_call_operand.hbm [shape: f32[2,4], index: 0, kind: input, shape index: {}]   ;;  %s449_s1 = inlined_call_operand.hbm [shape: f32[2,128], index: 1, kind: output, shape index: {}]  }
   0x1   :  { %7 = vsyncpa [#allocation4], 0  ;;  %s372_s6 = smov [#allocation2]   ;;  %s324_s10 = scalar_lea.hbm %s448_s0, 32 }
   0x2   :  { %s14_s7 = sshll.u32 %s372_s6, 4  ;;  %p325_p0 = scmp.ne.s32.totalorder %s448_s0, %s324_s10  ;;  %s15_s7 = int_to_ptr.vmem [resolvable:$true] %s14_s7 }
   0x3   :  { %p328_p1 = scmp.lt.u32.totalorder %s324_s10, %s448_s0 }
   0x5   :  { %p330_p2 = pnand %p328_p1, %p325_p0 }
   0x7   :  { %333 = shalt.err (!%p330_p2)
}
   0x8   :  { %s334_s15 = scalar_lea.vmem %s15_s7, 32  ;;  %p339_p4 = scmp.lt.s32.totalorder %s15_s7, %s15_s7 }
   0x9   :  { %p335_p3 = scmp.ne.s32.totalorder %s15_s7, %s334_s15  ;;  %p340_p5 = scmp.lt.s32.totalorder %s334_s15, %s334_s15 }
   0xb   :  { %p341_p6 = por %p340_p5, %p339_p4 }
   0xd   :  { %p342_p7 = pnand %p341_p6, %p335_p3 }
   0xf   :  { %345 = shalt.err (!%p342_p7)
}
  0x10   :  { %17 = dma.hbm_to_vmem [thread:$0]  %s448_s0, 32, %s15_s7, [#allocation3]  }
  0x11   :  { %368 = dma.done.wait [#allocation3], 32  }
  0x12   :  { %369 = vsyncadd [#allocation3], 4294967264  ;;  %v373_v0 = vmov 1   ;;  %v374_v1 = vmov 2   ;;  %v31_v2 = vld [vmem:[#allocation2] sm:$0x3]  ;;  %v21_v5 = vlaneseq }
  0x13   :  { %313 = vset.pattern.permute.xlu0 %v373_v0  ;;  %315 = vset.pattern.permute.xlu1 %v374_v1  ;;  %v375_v3 = vmov 0   ;;  %v376_v4 = vmov 3   ;;  %v377_v32 = vmov 683565275   ;;  %v378_v34 = vmov 2475754826  }
  0x14   :  { %37 = vperm.xlu0 %313, %v31_v2   ;;  %49 = vperm.xlu1 %315, %v31_v2   ;;  %v22_v6 = vand.u32 127, %v21_v5  ;;  %v379_v37 = vmov 2131351028   ;;  %v380_v40 = vmov 2102212464   ;;  %s383_s0 = smov [#allocation5]  }
  0x15   :  { %v381_v43 = vmov 920167782   ;;  %v382_v46 = vmov 1326507024   ;;  %s279_s18 = sshll.u32 %s383_s0, 4  ;;  %s280_s18 = int_to_ptr.vmem [resolvable:$true] %s279_s18 }
  0x16   :  { %v406_v7 = vand.u32 31, %v22_v6  ;;  %vm32_vm1 = vcmp.ge.s32.totalorder %v22_v6, 32  ;;  %vm45_vm2 = vcmp.ge.s32.totalorder %v22_v6, 64  ;;  %vm53_vm3 = vcmp.ge.s32.totalorder %v22_v6, 96  ;;  %s346_s19 = scalar_lea.vmem %s280_s18, 32  ;;  %p351_p9 = scmp.lt.s32.totalorder %s280_s18, %s280_s18 }
  0x17   :  { %p347_p8 = scmp.ne.s32.totalorder %s280_s18, %s346_s19  ;;  %p352_p10 = scmp.lt.s32.totalorder %s346_s19, %s346_s19 }
  0x18   :  { %314 = vset.pattern.permute.xlu0 %v375_v3  ;;  %316 = vset.pattern.permute.xlu1 %v376_v4  ;;  %v288_v8 = vadd.s32 4294967280, %v406_v7  ;;  %vm24_vm0 = vcmp.lt.s32.totalorder %v406_v7, 16 }
  0x19   :  { %41 = vperm.xlu0 %314, %v31_v2   ;;  %57 = vperm.xlu1 %316, %v31_v2   ;;  %p353_p11 = por %p352_p10, %p351_p9 }
  0x1a   :  { %v26_v9 = vsel %vm24_vm0, %v406_v7, %v288_v8 }
  0x1b   :  { %v27_v10 = vcvt.s32.f32 %v26_v9  ;;  %p354_p12 = pnand %p353_p11, %p347_p8 }
  0x1d   :  { %317 = vset.pattern.permute.xlu0 %v376_v4  ;;  %v28_v11 = vmul.f32 -0.6140227, %v27_v10 }
  0x1f   :  { %v29_v12 = vmul.f32 1.442695, %v28_v11 }
  0x21   :  { %318 = vpow2.f32 %v29_v12 }
  0x2b   :  { %v319_v17 = vpop.eup %318 }
  0x93   :  { %v38_v13 = vpop.permute.xlu0 %37  ;;  %v50_v14 = vpop.permute.xlu1 %49 }
  0x98   :  { %v42_v15 = vpop.permute.xlu0 %41  ;;  %v58_v16 = vpop.permute.xlu1 %57 }
  0x99   :  { %v44_v18 = vsel %vm32_vm1, %v38_v13, %v42_v15 }
  0x9a   :  { %v52_v19 = vsel %vm45_vm2, %v50_v14, %v44_v18 }
  0x9b   :  { %v60_v20 = vsel %vm53_vm3, %v58_v16, %v52_v19 }
  0x9c   :  { %v413_v21 = vmul.f32 %v319_v17, %v60_v20 }
  0x9e   :  { %v65_v22 = vand.u32 2139095040, %v413_v21  ;;  %v62_v26 = vand.u32 2147483647, %v413_v21  ;;  %vm64_vm11 = vcmp.lt.s32.totalorder %v413_v21, 0 }
  0xa0   :  { %v66_v23 = vshrl.u32 %v65_v22, 23  ;;  %v69_v29 = vand.u32 8388607, %v62_v26  ;;  %vm63_vm12 = vcmp.le.f32.partialorder %v62_v26, 0.7853982 }
  0xa2   :  { %v289_v24 = vadd.s32 4294967169, %v66_v23  ;;  %v70_v48 = vor.u32 8388608, %v69_v29 }
  0xa4   :  { %v72_v25 = vadd.s32 1, %v289_v24  ;;  %v110_v62 = vshll.u32 %v70_v48, 8 }
  0xa6   :  { %vm73_vm4 = vcmp.gt.s32.totalorder %v72_v25, 0 }
  0xa7   :  { %v74_v27 = vsel %vm73_vm4, %v72_v25, 0  ;;  %vm154_vm4 = vweird.f32 %v413_v21 }
  0xa8   :  { %v76_v28 = vand.u32 31, %v74_v27  ;;  %v75_v31 = vshrl.u32 %v74_v27, 5 }
  0xaa   :  { %v77_v30 = vsub.s32 32, %v76_v28  ;;  %v79_v33 = vshll.u32 %v377_v32, %v76_v28  ;;  %v82_v35 = vshll.u32 %v378_v34, %v76_v28  ;;  %v85_v39 = vshll.u32 %v379_v37, %v76_v28 }
  0xab   :  { %v88_v42 = vshll.u32 %v380_v40, %v76_v28  ;;  %v91_v45 = vshll.u32 %v381_v43, %v76_v28  ;;  %vm94_vm5 = vcmp.lt.s32.totalorder %v75_v31, 1  ;;  %vm97_vm6 = vcmp.lt.s32.totalorder %v75_v31, 4 }
  0xac   :  { %v80_v36 = vshrl.u32 %v378_v34, %v77_v30  ;;  %v83_v38 = vshrl.u32 %v379_v37, %v77_v30  ;;  %v86_v41 = vshrl.u32 %v380_v40, %v77_v30  ;;  %v89_v44 = vshrl.u32 %v381_v43, %v77_v30 }
  0xad   :  { %v92_v47 = vshrl.u32 %v382_v46, %v77_v30  ;;  %v78_v57 = vshrl.u32 %v377_v32, %v77_v30  ;;  %vm96_vm7 = vcmp.lt.s32.totalorder %v75_v31, 3  ;;  %vm95_vm8 = vcmp.lt.s32.totalorder %v75_v31, 2 }
  0xae   :  { %v81_v49 = vor.u32 %v80_v36, %v79_v33  ;;  %v84_v50 = vor.u32 %v83_v38, %v82_v35  ;;  %v87_v51 = vor.u32 %v86_v41, %v85_v39  ;;  %v90_v52 = vor.u32 %v89_v44, %v88_v42 }
  0xaf   :  { %v93_v53 = vor.u32 %v92_v47, %v91_v45 }
  0xb0   :  { %v99_v54 = vsel %vm97_vm6, %v87_v51, 2102212464  ;;  %v102_v55 = vsel %vm94_vm5, %v81_v49, %v84_v50  ;;  %v106_v56 = vsel %vm94_vm5, %v84_v50, %v87_v51  ;;  %v103_v58 = vsel %vm97_vm6, %v90_v52, 920167782 }
  0xb1   :  { %v107_v59 = vsel %vm97_vm6, %v93_v53, 1326507024  ;;  %v104_v60 = vsel %vm96_vm7, %v87_v51, %v103_v58  ;;  %v98_v63 = vsel %vm94_vm5, %v78_v57, %v81_v49  ;;  %v100_v0 = vsel %vm96_vm7, %v84_v50, %v99_v54 }
  0xb2   :  { %v108_v61 = vsel %vm96_vm7, %v90_v52, %v107_v59  ;;  %v105_v1 = vsel %vm95_vm8, %v102_v55, %v104_v60  ;;  %v101_v8 = vsel %vm95_vm8, %v98_v63, %v100_v0 }
  0xb3   :  { %v109_v2 = vsel %vm95_vm8, %v106_v56, %v108_v61  ;;  %v422_v5 = vmul.u32.u64.low %v110_v62, %v105_v1  ;;  %v423_v6 = vmul.u32.u64.high %v110_v62, %v105_v1, %v422_v5  ;;  %v117_v10 = vmul.u32 %v110_v62, %v101_v8 }
  0xb4   :  { %v419_v3 = vmul.u32.u64.low %v110_v62, %v109_v2  ;;  %v420_v4 = vmul.u32.u64.high %v110_v62, %v109_v2, %v419_v3 }
  0xb5   :  { %v120_v9 = vadd.s32 1, %v423_v6 }
  0xb6   :  { %vm119_vm9 = vc.u32 %v420_v4, %v422_v5  ;;  %v118_v23 = vadd.s32 %v422_v5, %v420_v4 }
  0xb7   :  { %v121_v11 = vsel %vm119_vm9, %v120_v9, %v423_v6 }
  0xb8   :  { %v122_v12 = vadd.s32 %v121_v11, %v117_v10 }
  0xba   :  { %v123_v13 = vadd.s32 536870912, %v122_v12 }
  0xbc   :  { %v124_v14 = vshrl.u32 %v123_v13, 30 }
  0xbe   :  { %v125_v15 = vshll.u32 %v124_v14, 30  ;;  %v148_v36 = vsub.s32 4, %v124_v14 }
  0xc0   :  { %v126_v16 = vsub.s32 %v122_v12, %v125_v15  ;;  %v149_v39 = vsel %vm64_vm11, %v148_v36, %v124_v14 }
  0xc1   :  { %v151_v41 = vsel %vm63_vm12, 0, %v149_v39 }
  0xc2   :  { %v128_v17 = vsub.s32 0, %v126_v16  ;;  %v155_v42 = vadd.s32 3, %v151_v41  ;;  %v259_v44 = vand.u32 3, %v151_v41 }
  0xc4   :  { %v290_v18 = vmin.u32 %v128_v17, %v126_v16  ;;  %v156_v43 = vand.u32 3, %v155_v42  ;;  %vm264_vm14 = vcmp.eq.s32.totalorder %v259_v44, 2  ;;  %vm261_vm1 = vcmp.eq.s32.totalorder %v259_v44, 0 }
  0xc5   :  { %vm260_vm3 = vcmp.lt.s32.totalorder %v259_v44, 2 }
  0xc6   :  { %v130_v19 = vclz %v290_v18  ;;  %vm161_vm13 = vcmp.eq.s32.totalorder %v156_v43, 2  ;;  %vm158_vm15 = vcmp.eq.s32.totalorder %v156_v43, 0  ;;  %vm157_vm2 = vcmp.lt.s32.totalorder %v156_v43, 2 }
  0xc8   :  { %v291_v20 = vadd.s32 4294967294, %v130_v19 }
  0xca   :  { %vm292_vm10 = vcmp.lt.s32.totalorder %v291_v20, 0 }
  0xcb   :  { %v133_v22 = vsel %vm292_vm10, 0, %v291_v20 }
  0xcc   :  { %v134_v24 = vsub.s32 32, %v133_v22  ;;  %v138_v25 = vsub.s32 4294967266, %v133_v22  ;;  %v135_v27 = vshll.u32 %v126_v16, %v133_v22 }
  0xce   :  { %v136_v28 = vshrl.u32 %v118_v23, %v134_v24  ;;  %v139_v29 = vadd.s32 127, %v138_v25 }
  0xd0   :  { %v137_v30 = vor.u32 %v136_v28, %v135_v27  ;;  %v140_v31 = vshll.u32 %v139_v29, 23 }
  0xd2   :  { %v141_v32 = vor.u32 4788187, %v140_v31  ;;  %v144_v34 = vcvt.s32.f32 %v137_v30 }
  0xd4   :  { %v142_v33 = vand.u32 2147483647, %v141_v32 }
  0xd6   :  { %v145_v35 = vmul.f32 %v144_v34, %v142_v33 }
  0xd8   :  { %v146_v37 = vxor.u32 2147483648, %v145_v35 }
  0xda   :  { %v147_v38 = vsel %vm64_vm11, %v146_v37, %v145_v35 }
  0xdb   :  { %v150_v40 = vsel %vm63_vm12, %v413_v21, %v147_v38 }
  0xdc   :  { %320 = vcosq.f32 %v150_v40 }
  0xdd   :  { %322 = vsinq.f32 %v150_v40 }
  0xe6   :  { %v321_v45 = vpop.eup %320 }
  0xe7   :  { %v323_v46 = vpop.eup %322  ;;  %v162_v47 = vxor.u32 2147483648, %v321_v45 }
  0xe8   :  { %v159_v48 = vxor.u32 2147483648, %v323_v46 }
  0xe9   :  { %v163_v49 = vsel %vm161_vm13, %v162_v47, %v323_v46  ;;  %v266_v50 = vsel %vm264_vm14, %v162_v47, %v323_v46 }
  0xea   :  { %v160_v26 = vsel %vm158_vm15, %v321_v45, %v159_v48  ;;  %v263_v51 = vsel %vm261_vm1, %v321_v45, %v159_v48 }
  0xeb   :  { %v164_v52 = vsel %vm157_vm2, %v160_v26, %v163_v49  ;;  %v267_v53 = vsel %vm260_vm3, %v263_v51, %v266_v50 }
  0xec   :  { %v165_v54 = vsel %vm154_vm4, nan, %v164_v52  ;;  %v268_v55 = vsel %vm154_vm4, nan, %v267_v53 }
  0xed   :  { %v271_v56 = vsel %vm24_vm0, %v165_v54, %v268_v55 }
  0xee   :  { %272 = vst [vmem:[#allocation5] sm:$0x3] %v271_v56 }
  0xef   :  { %357 = shalt.err (!%p354_p12)
}
  0xf0   :  { %s358_s22 = scalar_lea.hbm %s449_s1, 32 }
  0xf1   :  { %p359_p13 = scmp.ne.s32.totalorder %s449_s1, %s358_s22  ;;  %p362_p0 = scmp.lt.u32.totalorder %s358_s22, %s449_s1 }
  0xf3   :  { %p364_p1 = pnand %p362_p0, %p359_p13 }
  0xf5   :  { %367 = shalt.err (!%p364_p1)
}
  0xf6   :  { %282 = dma.vmem_to_hbm [thread:$0]  %s280_s18, 32, %s449_s1, [#allocation4]  }
  0xf7   :  { %370 = dma.done.wait [#allocation4], 32  }
  0xf8   :  { %371 = vsyncadd [#allocation4], 4294967264 }
  0xf9   :  { %286 = vsyncpa [#allocation3], 1 }
  0xfa   :  { %287 = vsyncpa [#allocation4], 1 }

</bundles_post_ra>
